<compile_context>
chip_gen: v5e
topology: v5e:2x2
jax: 0.10.0
libtpu: 0.0.40
codegen_flags: <defaults>
</compile_context>

<pallas_src>
import math

import numpy as np

import jax
import jax.numpy as jnp
from jax import lax
from jax.experimental import pallas as pl
from jax.experimental.pallas import tpu as pltpu


def _gaussian_1d(scale):
    """1-D normalized Gaussian taps + geometry (mirrors the PyTorch __init__)."""
    sigma = (1.0 / scale - 1.0) / 2.0
    ksize = 2 * round(sigma * 4) + 1
    ka = ksize // 2
    kb = ka - 1 if ksize % 2 == 0 else ka          # ksize is always odd -> kb == ka
    inv = int(1.0 / scale)
    ax = np.arange(ksize, dtype=np.float64)
    mean = (ksize - 1) / 2.0
    g = np.exp(-((ax - mean) ** 2) / (2.0 * sigma ** 2))
    gn = g / g.sum()                               # outer(gn, gn) == normalized 2-D kernel
    return gn, ksize, ka, kb, inv


def _filter_matrices(H, W, scale):
    """Banded matrices folding zero-pad + separable Gaussian + ::inv decimation.

        out_plane = Gv @ x_plane @ Gw,    Gv: (Ho, H),  Gw: (W, Wo)
    """
    gn, ksize, ka, _, inv = _gaussian_1d(scale)
    Ho = len(range(0, H, inv))
    Wo = len(range(0, W, inv))
    Gv = np.zeros((Ho, H), np.float64)
    for r in range(Ho):
        for h in range(H):
            kh = h - r * inv + ka                  # x[h] == xpad[h + ka]
            if 0 <= kh < ksize:
                Gv[r, h] = gn[kh]
    Gw = np.zeros((W, Wo), np.float64)
    for c in range(Wo):
        for w in range(W):
            kw = w - c * inv + ka
            if 0 <= kw < ksize:
                Gw[w, c] = gn[kw]
    return Gv.astype(np.float32), Gw.astype(np.float32), inv


def _plane_blocking(num_planes, plane_bytes, wo, budget_bytes=4 << 20, max_unroll=128):
    """Pick (planes-per-block cb, padded plane count).

    Rules (perf review):
      * block input bytes ~ budget (amortizes ~0.35us/step; 4 MiB is v7x-safe),
      * with >1 grid step, cb*Wo must be a multiple of 128 so the packed output
        block is a lane-aligned store target,
      * prefer zero plane padding (padding costs a full HBM copy of the input),
        then an even step count (keeps both v7x TensorCores busy), then larger
        blocks / fewer steps.
    """
    q = 128 // math.gcd(128, wo)          # cb granularity for lane-aligned output blocks
    steps_min = (num_planes * plane_bytes + budget_bytes - 1) // budget_bytes
    if steps_min <= 1:
        return num_planes, num_planes     # one full block; trivially aligned
    cb_cap = min(num_planes, max(1, budget_bytes // plane_bytes), max_unroll)
    cb_cap = max(q, (cb_cap // q) * q)
    best, best_key = None, None
    for cb in range(q, cb_cap + 1, q):
        steps = (num_planes + cb - 1) // cb
        pad = cb * steps - num_planes
        key = (pad != 0, steps % 2 != 0, pad, steps)
        if best_key is None or key < best_key:
            best, best_key = cb, key
    steps = (num_planes + best - 1) // best
    return best, best * steps


def _aa_kernel(x_ref, gv_ref, gw_ref, o_ref, xwt_ref):
    """x_ref: (cb, Hp, W)  gv_ref: (Ho, Hp)  gw_ref: (W, Wo)
       o_ref: (Ho, cb*Wo) lane-dense packed slab   xwt_ref: (Hp, cb*Wo) scratch."""
    cb, hp, w = x_ref.shape
    wo = gw_ref.shape[1]
    # Horizontal Gaussian filter + ::inv decimation for all cb planes with ONE
    # MXU matmul.  Merging (cb, Hp) onto the sublane axis is relayout-free
    # because the wrapper guarantees Hp % 8 == 0.
    xw = jnp.dot(x_ref[...].reshape(cb * hp, w), gw_ref[...],
                 preferred_element_type=jnp.float32)
    # bf16 inputs: drop the f32 intermediate back to bf16 so the vertical matmul
    # stays on the fast bf16 MXU path (accumulation below remains f32).
    xw = xw.astype(xwt_ref.dtype).reshape(cb, hp, wo)
    # Pack the cb planes onto the lane axis (VMEM-local slice stores: store/XLU
    # slots only, no MXU or HBM cost) so the vertical pass is one wide-N matmul
    # and the output block is a lane-dense slab.
    for c in range(cb):
        xwt_ref[:, c * wo:(c + 1) * wo] = xw[c]
    # Vertical Gaussian filter + decimation, merged over all cb planes.
    o_ref[...] = jnp.dot(gv_ref[...], xwt_ref[...],
                         preferred_element_type=jnp.float32).astype(o_ref.dtype)


def anti_alias_interpolation2d(x, channels, scale):
    """Forward pass of AntiAliasInterpolation2d.  x: (N, C, H, W)."""
    if scale == 1.0:
        return x
    assert 0.0 < scale < 1.0, "scale must lie in (0, 1] like the PyTorch module"
    N, C, H, W = x.shape
    assert C == channels

    gv_np, gw_np, _ = _filter_matrices(H, W, scale)
    Ho, Wo = gv_np.shape[0], gw_np.shape[1]

    # Pad H to a multiple of 8 (zero rows in x, matching zero columns in Gv) so
    # in-kernel sublane merges are free.  Only triggers an input copy if needed.
    Hp = ((H + 7) // 8) * 8
    if Hp != H:
        gv_np = np.pad(gv_np, ((0, 0), (0, Hp - H)))

    itemsize = np.dtype(x.dtype).itemsize
    P = N * C
    cb, P_pad = _plane_blocking(P, Hp * W * itemsize, Wo)

    x2 = x.reshape(P, H, W)
    if Hp != H or P_pad != P:
        x2 = jnp.pad(x2, ((0, P_pad - P), (0, Hp - H), (0, 0)))

    # Taps: bf16 when activations are bf16 (keeps both dots on the bf16 MXU
    # path), f32 otherwise for parity with the f32 PyTorch conv.
    # TODO(synk): on v5e (no f32 MXU path) casting f32 activations+taps to bf16
    # in-kernel would be ~3x faster; kept f32 here to preserve f32 numerics.
    mat_dtype = jnp.bfloat16 if x.dtype == jnp.bfloat16 else jnp.float32
    gv = jnp.asarray(gv_np, dtype=mat_dtype)
    gw = jnp.asarray(gw_np, dtype=mat_dtype)

    # Generous VMEM budget: double-buffered input/output blocks + packing scratch
    # + resident filter matrices (well under v7x's 64 MiB physical VMEM).
    mat_isize = np.dtype(mat_dtype).itemsize
    in_block = cb * Hp * W * itemsize
    out_block = Ho * cb * Wo * itemsize
    scratch_bytes = Hp * cb * Wo * mat_isize
    const_bytes = (Ho * Hp + W * Wo) * mat_isize
    need = 3 * in_block + 4 * out_block + 2 * scratch_bytes + 4 * const_bytes + (2 << 20)
    vmem_limit = int(min(48 << 20, max(16 << 20, need)))

    out_packed = pl.pallas_call(
        _aa_kernel,
        out_shape=jax.ShapeDtypeStruct((Ho, P_pad * Wo), x.dtype),
        grid=(P_pad // cb,),
        in_specs=[
            pl.BlockSpec((cb, Hp, W), lambda i: (i, 0, 0)),   # cb input planes
            pl.BlockSpec((Ho, Hp), lambda i: (0, 0)),         # vertical filter (resident)
            pl.BlockSpec((W, Wo), lambda i: (0, 0)),          # horizontal filter (resident)
        ],
        out_specs=pl.BlockSpec((Ho, cb * Wo), lambda i: (0, i)),  # lane-dense slab
        scratch_shapes=[pltpu.VMEM((Hp, cb * Wo), mat_dtype)],
        compiler_params=pltpu.CompilerParams(
            dimension_semantics=("parallel",),
            vmem_limit_bytes=vmem_limit),
    )(x2, gv, gw)

    # Un-pack the (tiny, inv^2-smaller) output slab: (Ho, P_pad*Wo) -> (N, C, Ho, Wo).
    out = out_packed.reshape(Ho, P_pad, Wo)[:, :P]
    out = jnp.transpose(out, (1, 0, 2)).reshape(N, C, Ho, Wo)
    return out


def _reference(x, channels, scale):
    """Pure-JAX reference (pad + grouped 2-D conv + strided slice)."""
    if scale == 1.0:
        return x
    gn, ksize, ka, kb, inv = _gaussian_1d(scale)
    k2d = np.outer(gn, gn).astype(np.float32)
    weight = jnp.asarray(np.tile(k2d[None, None], (channels, 1, 1, 1)))  # (C,1,ks,ks)
    xpad = jnp.pad(x.astype(jnp.float32), ((0, 0), (0, 0), (ka, kb), (ka, kb)))
    out = lax.conv_general_dilated(
        xpad, weight, window_strides=(1, 1), padding="VALID",
        dimension_numbers=("NCHW", "OIHW", "NCHW"),
        feature_group_count=channels,
        precision=lax.Precision.HIGHEST)
    return out[:, :, ::inv, ::inv].astype(x.dtype)


if __name__ == "__main__":
    N, C, H, W = 2, 4, 16, 16
    scale = 0.5                                    # sigma=0.5, ksize=5, stride 2
    key = jax.random.PRNGKey(0)
    x = jax.random.normal(key, (N, C, H, W), dtype=jnp.float32)

    out = anti_alias_interpolation2d(x, C, scale)
    out = jax.block_until_ready(out)

    ref = _reference(x, C, scale)
    assert out.shape == (N, C, H // 2, W // 2), out.shape
    assert jnp.allclose(out, ref, atol=2e-5, rtol=2e-5), "mismatch vs reference"
    print("KERNEL_OK")
</pallas_src>

<mosaic_0001>
module attributes {stable_mosaic.version = 11 : i64} {
  func.func @_aa_kernel(%arg0: i32, %arg1: memref<8x16x16xf32, #tpu.memory_space<vmem>>, %arg2: memref<8x16xf32, #tpu.memory_space<vmem>>, %arg3: memref<16x8xf32, #tpu.memory_space<vmem>>, %arg4: memref<8x64xf32, #tpu.memory_space<vmem>>, %arg5: memref<16x64xf32, #tpu.memory_space<vmem>>) attributes {dimension_semantics = [#tpu.dimension_semantics<parallel>], iteration_bounds = array<i64: 1>, scalar_prefetch = 0 : i64, scratch_operands = 1 : i64, tpu.core_type = #tpu.core_type<tc>, window_params = [{transform_indices = @transform_0, window_bounds = array<i64: 8, 16, 16>}, {pipeline_mode = #tpu.pipeline_mode<synchronous>, transform_indices = @transform_1, window_bounds = array<i64: 8, 16>}, {pipeline_mode = #tpu.pipeline_mode<synchronous>, transform_indices = @transform_2, window_bounds = array<i64: 16, 8>}, {transform_indices = @transform_3, window_bounds = array<i64: 8, 64>}]} {
    %c0 = arith.constant 0 : index
    %c0_0 = arith.constant 0 : index
    %c0_1 = arith.constant 0 : index
    %0 = vector.load %arg1[%c0, %c0_0, %c0_1] : memref<8x16x16xf32, #tpu.memory_space<vmem>>, vector<8x16x16xf32>
    %1 = vector.shape_cast %0 : vector<8x16x16xf32> to vector<128x16xf32>
    %c0_2 = arith.constant 0 : index
    %c0_3 = arith.constant 0 : index
    %2 = vector.load %arg3[%c0_2, %c0_3] : memref<16x8xf32, #tpu.memory_space<vmem>>, vector<16x8xf32>
    %cst = arith.constant dense<0.000000e+00> : vector<128x8xf32>
    %3 = tpu.matmul %1, %2, %cst {dimension_numbers = #tpu.dot_dimension_numbers<[1], [0], [0], [1], [0, 0, 1, 1], [], []>} : vector<128x16xf32>, vector<16x8xf32>, vector<128x8xf32> -> vector<128x8xf32>
    %4 = vector.shape_cast %3 : vector<128x8xf32> to vector<8x16x8xf32>
    %5 = vector.extract_strided_slice %4 {offsets = [0, 0, 0], sizes = [1, 16, 8], strides = [1, 1, 1]} : vector<8x16x8xf32> to vector<1x16x8xf32>
    %6 = vector.shape_cast %5 : vector<1x16x8xf32> to vector<16x8xf32>
    %c0_4 = arith.constant 0 : index
    %c0_5 = arith.constant 0 : index
    %7 = vector.load %arg5[%c0_4, %c0_5] : memref<16x64xf32, #tpu.memory_space<vmem>>, vector<16x8xf32>
    tpu.vector_store %arg5[%c0_4, %c0_5], %6 {strides = array<i32>} : memref<16x64xf32, #tpu.memory_space<vmem>>, vector<16x8xf32>,
    %8 = vector.extract_strided_slice %4 {offsets = [1, 0, 0], sizes = [1, 16, 8], strides = [1, 1, 1]} : vector<8x16x8xf32> to vector<1x16x8xf32>
    %9 = vector.shape_cast %8 : vector<1x16x8xf32> to vector<16x8xf32>
    %c0_6 = arith.constant 0 : index
    %c8 = arith.constant 8 : index
    %10 = vector.load %arg5[%c0_6, %c8] : memref<16x64xf32, #tpu.memory_space<vmem>>, vector<16x8xf32>
    tpu.vector_store %arg5[%c0_6, %c8], %9 {strides = array<i32>} : memref<16x64xf32, #tpu.memory_space<vmem>>, vector<16x8xf32>,
    %11 = vector.extract_strided_slice %4 {offsets = [2, 0, 0], sizes = [1, 16, 8], strides = [1, 1, 1]} : vector<8x16x8xf32> to vector<1x16x8xf32>
    %12 = vector.shape_cast %11 : vector<1x16x8xf32> to vector<16x8xf32>
    %c0_7 = arith.constant 0 : index
    %c16 = arith.constant 16 : index
    %13 = vector.load %arg5[%c0_7, %c16] : memref<16x64xf32, #tpu.memory_space<vmem>>, vector<16x8xf32>
    tpu.vector_store %arg5[%c0_7, %c16], %12 {strides = array<i32>} : memref<16x64xf32, #tpu.memory_space<vmem>>, vector<16x8xf32>,
    %14 = vector.extract_strided_slice %4 {offsets = [3, 0, 0], sizes = [1, 16, 8], strides = [1, 1, 1]} : vector<8x16x8xf32> to vector<1x16x8xf32>
    %15 = vector.shape_cast %14 : vector<1x16x8xf32> to vector<16x8xf32>
    %c0_8 = arith.constant 0 : index
    %c24 = arith.constant 24 : index
    %16 = vector.load %arg5[%c0_8, %c24] : memref<16x64xf32, #tpu.memory_space<vmem>>, vector<16x8xf32>
    tpu.vector_store %arg5[%c0_8, %c24], %15 {strides = array<i32>} : memref<16x64xf32, #tpu.memory_space<vmem>>, vector<16x8xf32>,
    %17 = vector.extract_strided_slice %4 {offsets = [4, 0, 0], sizes = [1, 16, 8], strides = [1, 1, 1]} : vector<8x16x8xf32> to vector<1x16x8xf32>
    %18 = vector.shape_cast %17 : vector<1x16x8xf32> to vector<16x8xf32>
    %c0_9 = arith.constant 0 : index
    %c32 = arith.constant 32 : index
    %19 = vector.load %arg5[%c0_9, %c32] : memref<16x64xf32, #tpu.memory_space<vmem>>, vector<16x8xf32>
    tpu.vector_store %arg5[%c0_9, %c32], %18 {strides = array<i32>} : memref<16x64xf32, #tpu.memory_space<vmem>>, vector<16x8xf32>,
    %20 = vector.extract_strided_slice %4 {offsets = [5, 0, 0], sizes = [1, 16, 8], strides = [1, 1, 1]} : vector<8x16x8xf32> to vector<1x16x8xf32>
    %21 = vector.shape_cast %20 : vector<1x16x8xf32> to vector<16x8xf32>
    %c0_10 = arith.constant 0 : index
    %c40 = arith.constant 40 : index
    %22 = vector.load %arg5[%c0_10, %c40] : memref<16x64xf32, #tpu.memory_space<vmem>>, vector<16x8xf32>
    tpu.vector_store %arg5[%c0_10, %c40], %21 {strides = array<i32>} : memref<16x64xf32, #tpu.memory_space<vmem>>, vector<16x8xf32>,
    %23 = vector.extract_strided_slice %4 {offsets = [6, 0, 0], sizes = [1, 16, 8], strides = [1, 1, 1]} : vector<8x16x8xf32> to vector<1x16x8xf32>
    %24 = vector.shape_cast %23 : vector<1x16x8xf32> to vector<16x8xf32>
    %c0_11 = arith.constant 0 : index
    %c48 = arith.constant 48 : index
    %25 = vector.load %arg5[%c0_11, %c48] : memref<16x64xf32, #tpu.memory_space<vmem>>, vector<16x8xf32>
    tpu.vector_store %arg5[%c0_11, %c48], %24 {strides = array<i32>} : memref<16x64xf32, #tpu.memory_space<vmem>>, vector<16x8xf32>,
    %26 = vector.extract_strided_slice %4 {offsets = [7, 0, 0], sizes = [1, 16, 8], strides = [1, 1, 1]} : vector<8x16x8xf32> to vector<1x16x8xf32>
    %27 = vector.shape_cast %26 : vector<1x16x8xf32> to vector<16x8xf32>
    %c0_12 = arith.constant 0 : index
    %c56 = arith.constant 56 : index
    %28 = vector.load %arg5[%c0_12, %c56] : memref<16x64xf32, #tpu.memory_space<vmem>>, vector<16x8xf32>
    tpu.vector_store %arg5[%c0_12, %c56], %27 {strides = array<i32>} : memref<16x64xf32, #tpu.memory_space<vmem>>, vector<16x8xf32>,
    %c0_13 = arith.constant 0 : index
    %c0_14 = arith.constant 0 : index
    %29 = vector.load %arg2[%c0_13, %c0_14] : memref<8x16xf32, #tpu.memory_space<vmem>>, vector<8x16xf32>
    %c0_15 = arith.constant 0 : index
    %c0_16 = arith.constant 0 : index
    %30 = vector.load %arg5[%c0_15, %c0_16] : memref<16x64xf32, #tpu.memory_space<vmem>>, vector<16x64xf32>
    %cst_17 = arith.constant dense<0.000000e+00> : vector<8x64xf32>
    %31 = tpu.matmul %29, %30, %cst_17 {dimension_numbers = #tpu.dot_dimension_numbers<[1], [0], [0], [1], [0, 0, 1, 1], [], []>} : vector<8x16xf32>, vector<16x64xf32>, vector<8x64xf32> -> vector<8x64xf32>
    %c0_18 = arith.constant 0 : index
    %c0_19 = arith.constant 0 : index
    %32 = vector.load %arg4[%c0_18, %c0_19] : memref<8x64xf32, #tpu.memory_space<vmem>>, vector<8x64xf32>
    tpu.vector_store %arg4[%c0_18, %c0_19], %31 {strides = array<i32>} : memref<8x64xf32, #tpu.memory_space<vmem>>, vector<8x64xf32>,
    return
  }
  func.func @transform_0(%arg0: i32) -> (i32, i32, i32) {
    %c0_i32 = arith.constant 0 : i32
    %c0_i32_0 = arith.constant 0 : i32
    %c0_i32_1 = arith.constant 0 : i32
    return %arg0, %c0_i32, %c0_i32_0 : i32, i32, i32
  }
  func.func @transform_1(%arg0: i32) -> (i32, i32) {
    %c0_i32 = arith.constant 0 : i32
    %c0_i32_0 = arith.constant 0 : i32
    %c0_i32_1 = arith.constant 0 : i32
    return %c0_i32, %c0_i32_0 : i32, i32
  }
  func.func @transform_2(%arg0: i32) -> (i32, i32) {
    %c0_i32 = arith.constant 0 : i32
    %c0_i32_0 = arith.constant 0 : i32
    %c0_i32_1 = arith.constant 0 : i32
    return %c0_i32, %c0_i32_0 : i32, i32
  }
  func.func @transform_3(%arg0: i32) -> (i32, i32) {
    %c0_i32 = arith.constant 0 : i32
    %c0_i32_0 = arith.constant 0 : i32
    return %c0_i32, %arg0 : i32, i32
  }
}

</mosaic_0001>

<bundles_post_ra>
// kernel: tpu_custom_call.1
= control target key start
LH: loop header
LB: loop body
LE: loop exit
PB: predicated region body
PF: predicated region fallthrough
CT: control target
= control target key end

     0   :  { %8 = vsyncpa [#allocation4], 0  ;;  %s440_s0 = inlined_call_operand.hbm [shape: f32[8,16,16], index: 0, kind: input, shape index: {}]   ;;  %s441_s1 = inlined_call_operand.vmem [shape: f32[8,16], index: 1, kind: input, shape index: {}]   ;;  %s442_s2 = inlined_call_operand.vmem [shape: f32[16,8], index: 2, kind: input, shape index: {}]   ;;  %s443_s3 = inlined_call_operand.hbm [shape: f32[8,64], index: 3, kind: output, shape index: {}]  }
   0x1   :  { %9 = vsyncpa [#allocation5], 0  ;;  %s14_s14 = sshll.u32 %s440_s0, 4  ;;  %s373_s15 = smov [#allocation3]   ;;  %s15_s14 = int_to_ptr.hbm [resolvable:$true] %s14_s14 }
   0x2   :  { %s16_s16 = sshll.u32 %s373_s15, 4  ;;  %s374_s17 = smov 128   ;;  %s17_s16 = int_to_ptr.vmem [resolvable:$true] %s16_s16 }
   0x3   :  { %s375_s18 = smov 8  }
   0x4   :  { %22 = dma.hbm_to_vmem [thread:$0]  %s15_s14, 2048, %s17_s16, [#allocation4], %s374_s17, %s374_s17, %s375_s18  }
   0x5   :  { %369 = dma.done.wait [#allocation4], 2048  }
   0x6   :  { %370 = vsyncadd [#allocation4], 4294965248  ;;  %v48_v0 = vld [vmem:[%s442_s2 + $0x8] sm:$0xff]  ;;  %v47_v1 = vld [vmem:[%s442_s2] sm:$0xff]  ;;  %vm49_vm0 = vcmask 130048   ;;  %s376_s0 = smov 16  }
   0x7   :  { %305 = vmatpush.msra.mxu1 %v48_v0  ;;  %306 = vmatpush.msra.mxu2 %v48_v0  ;;  %v36_v2 = vld [vmem:[#allocation3 + $0x28] sm:$0xff]  ;;  %v37_v3 = vld [vmem:[#allocation3 + $0x30] sm:$0xff]  ;;  %v42_v4 = vld [vmem:[#allocation3 + $0x58] sm:$0xff]  ;;  %vm163_vm1 = vcmask 64512   ;;  %s377_s2 = smov 40   ;;  %s378_s23 = smov 24  }
   0x8   :  { %307 = vmatpush.msra.mxu3 %v48_v0  ;;  %112 = vmatpush.msra.mxu0 %v48_v0  ;;  %v31_v5 = vld [vmem:[#allocation3] sm:$0xff]  ;;  %v38_v6 = vld [vmem:[#allocation3 + $0x38] sm:$0xff]  ;;  %v32_v8 = vld [vmem:[#allocation3 + $0x8] sm:$0xff]  ;;  %s379_s24 = smov 32   ;;  %s380_s25 = smov 48   ;;  %vm174_vm2 = vcmask 130112  }
   0x9   :  { %308 = vmatpush.msra.mxu1 %v47_v1  ;;  %309 = vmatpush.msra.mxu2 %v47_v1  ;;  %v43_v7 = vld [vmem:[#allocation3 + $0x60] sm:$0xff]  ;;  %v44_v10 = vld [vmem:[#allocation3 + $0x68] sm:$0xff]  ;;  %v33_v11 = vld [vmem:[#allocation3 + $0x10] sm:$0xff]  ;;  %s381_s26 = smov 56   ;;  %vm185_vm3 = vcmask 195712   ;;  %vm196_vm4 = vcmask 261312  }
   0xa   :  { %310 = vmatpush.msra.mxu3 %v47_v1  ;;  %293 = vmatmul.msk.f32.vlgmr.msra.gmra.mxu1 %vm49_vm0, %v36_v2  ;;  %v39_v9 = vld [vmem:[#allocation3 + $0x40] sm:$0xff]  ;;  %v40_v12 = vld [vmem:[#allocation3 + $0x48] sm:$0xff]  ;;  %v45_v13 = vld [vmem:[#allocation3 + $0x70] sm:$0xff]  ;;  %vm207_vm5 = vcmask 326912   ;;  %vm218_vm6 = vcmask 392512   ;;  %vm229_vm7 = vcmask 458112  }
   0xb   :  { %294 = vmatmul.msk.f32.vlgmr.msra.gmra.mxu2 %vm49_vm0, %v37_v3  ;;  %299 = vmatmul.msk.f32.vlgmr.msra.gmra.mxu3 %vm49_vm0, %v42_v4  ;;  %v34_v14 = vld [vmem:[#allocation3 + $0x18] sm:$0xff]  ;;  %v41_v15 = vld [vmem:[#allocation3 + $0x50] sm:$0xff]  ;;  %v35_v17 = vld [vmem:[#allocation3 + $0x20] sm:$0xff]  ;;  %vm240_vm8 = vcmask 523712   ;;  %s382_s29 = smov [#allocation6]   ;;  %s278_s6 = sshll.u32 %s443_s3, 4  ;;  %s279_s6 = int_to_ptr.hbm [resolvable:$true] %s278_s6 }
   0xc   :  { %113 = vmatpush.msra.mxu0 %v47_v1  ;;  %v46_v16 = vld [vmem:[#allocation3 + $0x78] sm:$0xff]  ;;  %v243_v49 = vld [vmem:[%s441_s1] sm:$0xff]  ;;  %s276_s30 = sshll.u32 %s382_s29, 4  ;;  %vm269_vm9 = vcmask 523264   ;;  %s277_s30 = int_to_ptr.vmem [resolvable:$true] %s276_s30 }
   0xd   :  { %288 = vmatmul.msk.f32.vlgmr.msra.gmra.mxu0 %vm49_vm0, %v31_v5 }
  0x13   :  { %295 = vmatmul.msk.f32.gmra.mxu2 %vm49_vm0, %v38_v6  ;;  %300 = vmatmul.msk.f32.gmra.mxu3 %vm49_vm0, %v43_v7 }
  0x15   :  { %289 = vmatmul.msk.f32.gmra.mxu0 %vm49_vm0, %v32_v8 }
  0x1b   :  { %296 = vmatmul.msk.f32.gmra.mxu2 %vm49_vm0, %v39_v9  ;;  %301 = vmatmul.msk.f32.gmra.mxu3 %vm49_vm0, %v44_v10 }
  0x1d   :  { %290 = vmatmul.msk.f32.gmra.mxu0 %vm49_vm0, %v33_v11 }
  0x23   :  { %297 = vmatmul.msk.f32.gmra.mxu2 %vm49_vm0, %v40_v12  ;;  %302 = vmatmul.msk.f32.gmra.mxu3 %vm49_vm0, %v45_v13 }
  0x25   :  { %291 = vmatmul.msk.f32.gmra.mxu0 %vm49_vm0, %v34_v14 }
  0x2b   :  { %298 = vmatmul.msk.f32.gmra.mxu2 %vm49_vm0, %v41_v15  ;;  %303 = vmatmul.msk.f32.gmra.mxu3 %vm49_vm0, %v46_v16 }
  0x2d   :  { %292 = vmatmul.msk.f32.gmra.mxu0 %vm49_vm0, %v35_v17 }
  0x87   :  { %v130_v18 = vpop.f32.mrf.mxu1 }
  0x88   :  { %181 = vrot.lane.b32.xlu0 %v130_v18, %s376_s0 }
  0x8a   :  { %v115_v19 = vpop.f32.mrf.mxu0 }
  0x8b   :  { %164 = vst.msk [vmem:[#allocation2] sm:$0xff] %vm163_vm1, %v115_v19 }
  0x8e   :  { %v133_v20 = vpop.f32.mrf.mxu2  ;;  %v148_v21 = vpop.f32.mrf.mxu3 }
  0x8f   :  { %214 = vrot.lane.b32.xlu1 %v148_v21, %s377_s2 }
  0x90   :  { %190 = vrot.lane.b32.xlu0 %v133_v20, %s378_s23 }
  0x92   :  { %v118_v22 = vpop.f32.mrf.mxu0 }
  0x93   :  { %165 = vst.msk [vmem:[#allocation2 + $0x8] sm:$0xff] %vm163_vm1, %v118_v22 }
  0x96   :  { %v136_v23 = vpop.f32.mrf.mxu2  ;;  %v151_v24 = vpop.f32.mrf.mxu3 }
  0x97   :  { %192 = vrot.lane.b32.xlu1 %v136_v23, %s378_s23 }
  0x9a   :  { %v121_v25 = vpop.f32.mrf.mxu0 }
  0x9e   :  { %v139_v26 = vpop.f32.mrf.mxu2  ;;  %v154_v27 = vpop.f32.mrf.mxu3 }
  0x9f   :  { %201 = vrot.lane.b32.xlu2 %v139_v26, %s379_s24  ;;  %225 = vrot.lane.b32.xlu0 %v154_v27, %s380_s25 }
  0xa0   :  { %168 = vrot.lane.b32.xlu1 %v121_v25, %s375_s18 }
  0xa2   :  { %v124_v28 = vpop.f32.mrf.mxu0 }
  0xa6   :  { %v142_v29 = vpop.f32.mrf.mxu2  ;;  %v157_v30 = vpop.f32.mrf.mxu3 }
  0xa7   :  { %203 = vrot.lane.b32.xlu2 %v142_v29, %s379_s24  ;;  %170 = vrot.lane.b32.xlu0 %v124_v28, %s375_s18 }
  0xaa   :  { %v127_v31 = vpop.f32.mrf.mxu0 }
  0xae   :  { %v145_v32 = vpop.f32.mrf.mxu2  ;;  %v160_v33 = vpop.f32.mrf.mxu3 }
  0xaf   :  { %212 = vrot.lane.b32.xlu1 %v145_v32, %s377_s2  ;;  %223 = vrot.lane.b32.xlu0 %v151_v24, %s380_s25 }
  0xb0   :  { %179 = vrot.lane.b32.xlu2 %v127_v31, %s376_s0 }
  0xb7   :  { %234 = vrot.lane.b32.xlu1 %v157_v30, %s381_s26 }
  0xb8   :  { %236 = vrot.lane.b32.xlu2 %v160_v33, %s381_s26 }
  0xf9   :  { %v202_v34 = vpop.permute.xlu2 %201 }
  0xfa   :  { %v182_v35 = vpop.permute.xlu0 %181 }
 0x101   :  { %v215_v36 = vpop.permute.xlu1 %214  ;;  %v204_v37 = vpop.permute.xlu2 %203 }
 0x102   :  { %v191_v38 = vpop.permute.xlu0 %190 }
 0x109   :  { %v193_v39 = vpop.permute.xlu1 %192 }
 0x10a   :  { %v180_v41 = vpop.permute.xlu2 %179 }
 0x111   :  { %v226_v40 = vpop.permute.xlu0 %225 }
 0x112   :  { %v169_v42 = vpop.permute.xlu1 %168  ;;  %v237_v44 = vpop.permute.xlu2 %236 }
 0x113   :  { %175 = vst.msk [vmem:[#allocation2] sm:$0xff] %vm174_vm2, %v169_v42 }
 0x114   :  { %186 = vst.msk [vmem:[#allocation2] sm:$0xff] %vm185_vm3, %v180_v41 }
 0x115   :  { %197 = vst.msk [vmem:[#allocation2] sm:$0xff] %vm196_vm4, %v191_v38 }
 0x116   :  { %208 = vst.msk [vmem:[#allocation2] sm:$0xff] %vm207_vm5, %v202_v34 }
 0x119   :  { %v171_v43 = vpop.permute.xlu0 %170 }
 0x11a   :  { %176 = vst.msk [vmem:[#allocation2 + $0x8] sm:$0xff] %vm174_vm2, %v171_v43 }
 0x11b   :  { %187 = vst.msk [vmem:[#allocation2 + $0x8] sm:$0xff] %vm185_vm3, %v182_v35 }
 0x11c   :  { %198 = vst.msk [vmem:[#allocation2 + $0x8] sm:$0xff] %vm196_vm4, %v193_v39 }
 0x11d   :  { %209 = vst.msk [vmem:[#allocation2 + $0x8] sm:$0xff] %vm207_vm5, %v204_v37 }
 0x11e   :  { %220 = vst.msk [vmem:[#allocation2 + $0x8] sm:$0xff] %vm218_vm6, %v215_v36 }
 0x11f   :  { %231 = vst.msk [vmem:[#allocation2 + $0x8] sm:$0xff] %vm229_vm7, %v226_v40 }
 0x120   :  { %242 = vst.msk [vmem:[#allocation2 + $0x8] sm:$0xff] %vm240_vm8, %v237_v44 }
 0x121   :  { %v213_v45 = vpop.permute.xlu1 %212  ;;  %v224_v46 = vpop.permute.xlu0 %223 }
 0x122   :  { %219 = vst.msk [vmem:[#allocation2] sm:$0xff] %vm218_vm6, %v213_v45 }
 0x123   :  { %230 = vst.msk [vmem:[#allocation2] sm:$0xff] %vm229_vm7, %v224_v46 }
 0x127   :  { %v245_v47 = vld [vmem:[#allocation2 + $0x8] sm:$0xff] }
 0x128   :  { %263 = vmatpush.msrb.mxu1 %v245_v47 }
 0x129   :  { %v235_v48 = vpop.permute.xlu1 %234 }
 0x12a   :  { %241 = vst.msk [vmem:[#allocation2] sm:$0xff] %vm240_vm8, %v235_v48 }
 0x131   :  { %v244_v50 = vld [vmem:[#allocation2] sm:$0xff] }
 0x132   :  { %264 = vmatpush.msrb.mxu1 %v244_v50 }
 0x133   :  { %304 = vmatmul.msk.f32.vlgmr.msrb.gmra.mxu1 %vm49_vm0, %v243_v49 }
 0x1b0   :  { %v266_v51 = vpop.f32.mrf.mxu1 }
 0x1b1   :  { %270 = vst.msk [vmem:[#allocation6] sm:$0xff] %vm269_vm9, %v266_v51 }
 0x1b2   :  { %281 = dma.vmem_to_hbm [thread:$0]  %s277_s30, 128, %s279_s6, [#allocation5]  }
 0x1b3   :  { %371 = dma.done.wait [#allocation5], 128  }
 0x1b4   :  { %372 = vsyncadd [#allocation5], 4294967168 }
 0x1b5   :  { %286 = vsyncpa [#allocation4], 1 }
 0x1b6   :  { %287 = vsyncpa [#allocation5], 1 }

</bundles_post_ra>
